<compile_context>
chip_gen: v6e
topology: v6e:2x2x1
jax: 0.10.0
libtpu: 0.0.40
codegen_flags: <defaults>
</compile_context>

<pallas_src>
import functools
import math

import jax
import jax.numpy as jnp
from jax.experimental import pallas as pl
from jax.experimental.pallas import tpu as pltpu


def _recip(x):
    # EUP approximate reciprocal (off the VPU / critical path) + one Newton step so the
    # result stays at ~f32 accuracy for the 1e-3 reference comparison.
    r = pl.reciprocal(x, approx=True)
    return r * (2.0 - x * r)


def _instance_mlp_kernel(tea_ref, stu_ref, p_ref, out_ref, *, topk, eps):
    # Inputs may arrive in bf16; cast in-kernel (free VPU op), keep the DMA narrow.
    tea_logits = tea_ref[...].astype(jnp.float32)
    stu_logits = stu_ref[...].astype(jnp.float32)
    B = tea_logits.shape[0]
    k2 = 2 * topk

    # --- F.softmax(..., dim=1) on teacher and student logits -----------------------
    tea_rowmax = jnp.max(tea_logits, axis=-1, keepdims=True)
    tea_shift = tea_logits - tea_rowmax
    tea_exp = jnp.exp(tea_shift)
    tea_inv = _recip(jnp.sum(tea_exp, axis=-1, keepdims=True))   # == max(softmax(tea))
    tea = tea_exp * tea_inv

    stu_rowmax = jnp.max(stu_logits, axis=-1, keepdims=True)
    stu_exp = jnp.exp(stu_logits - stu_rowmax)
    stu_inv = _recip(jnp.sum(stu_exp, axis=-1, keepdims=True))
    stu = stu_exp * stu_inv

    # --- torch.topk(tea, k, dim=1) + stu.gather(1, indices) ------------------------
    # Round 0 reuses the softmax work: the top value is tea_inv, and the argmax lanes
    # are exactly where the shifted logits are 0 -> no extra lane reduction on the
    # serial chain for round 0.  Selected entries are masked with a finite sentinel
    # (-1.0), strictly below any softmax output.
    lane = jax.lax.broadcasted_iota(jnp.int32, (B, k2), 1)
    sel = tea_shift == 0.0
    stu_pick = jnp.sum(jnp.where(sel, stu, 0.0), axis=-1, keepdims=True)   # off-chain
    comb = jnp.where(lane == 0, tea_inv, 0.0)            # comb[:, 0]     = tea top-1
    comb = jnp.where(lane == topk, stu_pick, comb)       # comb[:, topk]  = stu gather
    tea_work = jnp.where(sel, -1.0, tea)

    for r in range(1, topk):
        m = jnp.max(tea_work, axis=-1, keepdims=True)    # only lane-reduce on the chain
        sel = tea_work == m
        stu_pick = jnp.sum(jnp.where(sel, stu, 0.0), axis=-1, keepdims=True)  # off-chain
        comb = jnp.where(lane == r, m, comb)
        comb = jnp.where(lane == topk + r, stu_pick, comb)
        tea_work = jnp.where(sel, -1.0, tea_work)

    # --- packed parameters: [inter, 2*topk + 4] = [ W1 | gamma | beta | w2 | b2 ] ---
    P = p_ref[...]
    w1 = P[:, 0:k2]                     # conv1 weight, PyTorch layout [inter, 2*topk]
    gamma = P[:, k2:k2 + 1]             # [inter, 1]
    beta = P[:, k2 + 1:k2 + 2]          # [inter, 1]
    w2 = P[:, k2 + 2:k2 + 3]            # conv2 weight as a column [inter, 1]
    b2 = P[0:1, k2 + 3:k2 + 4]          # conv2 bias, [1, 1]

    # conv1 (bias dropped: cancels exactly under training-mode BatchNorm), computed
    # transposed so batch lives on lanes.  NT dot_general: no materialized comb.T.
    h = jax.lax.dot_general(w1, comb,
                            dimension_numbers=(((1,), (1,)), ((), ())),
                            preferred_element_type=jnp.float32)            # [inter, B]

    # BatchNorm2d (training-mode batch stats, biased variance) via one-pass statistics:
    # the two lane reductions are independent and co-issue on the XLUs.
    inv_b = 1.0 / B
    s1 = jnp.sum(h, axis=1, keepdims=True)
    s2 = jnp.sum(h * h, axis=1, keepdims=True)
    mean = s1 * inv_b
    var = jnp.maximum(s2 * inv_b - mean * mean, 0.0)
    hn = gamma * (h - mean) * jax.lax.rsqrt(var + eps) + beta
    hn = jnp.maximum(hn, 0.0)                                              # ReLU

    # conv2 (inter -> 1): VPU multiply + one sublane reduction -> lane-dense [1, B].
    # GradientReversal forward = identity (lambda_ only scales the backward pass).
    out_ref[...] = jnp.sum(hn * w2, axis=0, keepdims=True) + b2


def instance_mlp_forward(teacher_out, student_out, lambda_, packed_params, *, topk_num):
    del lambda_  # only affects the backward pass (gradient reversal scaling)
    B, _ = teacher_out.shape
    assert packed_params.shape[1] == 2 * topk_num + 4

    kernel = functools.partial(_instance_mlp_kernel, topk=topk_num, eps=1e-5)

    def fullspec(shape):
        return pl.BlockSpec(shape, lambda i: (0,) * len(shape))

    out = pl.pallas_call(
        kernel,
        out_shape=jax.ShapeDtypeStruct((1, B), jnp.float32),   # lane-dense output row
        grid=(1,),
        in_specs=[
            fullspec(teacher_out.shape),
            fullspec(student_out.shape),
            fullspec(packed_params.shape),
        ],
        out_specs=fullspec((1, B)),
        compiler_params=pltpu.CompilerParams(dimension_semantics=("arbitrary",)),
    )(teacher_out, student_out, packed_params)

    return out.reshape(-1)   # T.view(-1) -> [B]


def init_params(key, topk_num, inter_channel):
    # Deterministic synthetic init following the module's __init__.
    k1, k2 = jax.random.split(key)
    fan_in = 2 * topk_num
    bound = 1.0 / math.sqrt(fan_in)
    # conv1: Conv2d(2*topk, inter, 1) -> weight [inter, 2*topk], bias [inter]
    w1 = jax.random.uniform(k1, (inter_channel, 2 * topk_num), jnp.float32, -bound, bound)
    b1 = jax.random.uniform(k2, (inter_channel,), jnp.float32, -bound, bound)
    # BatchNorm2d(inter): gamma=1, beta=0 (default init)
    gamma = jnp.ones((inter_channel, 1), jnp.float32)
    beta = jnp.zeros((inter_channel, 1), jnp.float32)
    # conv2: Conv2d(inter, 1, 1) -- __init__ zero-inits weight & bias
    w2 = jnp.zeros((inter_channel, 1), jnp.float32)
    b2 = jnp.float32(0.0)
    return w1, b1, gamma, beta, w2, b2


def pack_params(w1, gamma, beta, w2, b2):
    # b1 is intentionally NOT packed: it cancels exactly under training-mode BatchNorm.
    inter = w1.shape[0]
    b2_col = jnp.zeros((inter, 1), jnp.float32).at[0, 0].set(b2)
    return jnp.concatenate([w1, gamma, beta, w2, b2_col], axis=1).astype(jnp.float32)


def instance_mlp_reference(teacher_out, student_out, w1, b1, gamma, beta, w2, b2,
                           topk_num, eps=1e-5):
    # Pure-JAX mirror of the PyTorch forward (includes b1, proving the cancellation).
    tea = jax.nn.softmax(teacher_out, axis=1)
    stu = jax.nn.softmax(student_out, axis=1)
    tea_topk, idx = jax.lax.top_k(tea, topk_num)
    stu_topk = jnp.take_along_axis(stu, idx, axis=1)
    comb = jnp.concatenate([tea_topk, stu_topk], axis=1)
    h = jnp.dot(comb, w1.T, precision=jax.lax.Precision.HIGHEST) + b1.reshape(1, -1)
    mean = jnp.mean(h, axis=0, keepdims=True)
    var = jnp.mean((h - mean) ** 2, axis=0, keepdims=True)
    h = gamma.reshape(1, -1) * (h - mean) * jax.lax.rsqrt(var + eps) + beta.reshape(1, -1)
    h = jnp.maximum(h, 0.0)
    return jnp.sum(h * w2.reshape(1, -1), axis=1) + b2


if __name__ == "__main__":
    lambda_ = 1.0

    def run_case(case_key, B, C, topk, inter):
        k_t, k_s, k_p, k_w2 = jax.random.split(case_key, 4)
        teacher_out = jax.random.normal(k_t, (B, C), jnp.float32)
        student_out = jax.random.normal(k_s, (B, C), jnp.float32)
        w1, b1, gamma, beta, w2, b2 = init_params(k_p, topk, inter)

        # 1) Faithful module init (conv2 zero-initialized).
        packed = pack_params(w1, gamma, beta, w2, b2)
        out = jax.block_until_ready(
            instance_mlp_forward(teacher_out, student_out, lambda_, packed, topk_num=topk))
        ref = instance_mlp_reference(teacher_out, student_out, w1, b1, gamma, beta,
                                     w2, b2, topk)
        assert out.shape == (B,), out.shape
        assert bool(jnp.all(jnp.isfinite(out)))
        assert bool(jnp.allclose(out, ref, atol=1e-3, rtol=1e-3))

        # 2) Non-zero conv2 so the full softmax/top-k/conv1/BN/ReLU/conv2 path is
        #    exercised numerically (not multiplied by zero).
        w2_nz = jax.random.normal(k_w2, (inter, 1), jnp.float32) * 0.1
        b2_nz = jnp.float32(0.25)
        packed_nz = pack_params(w1, gamma, beta, w2_nz, b2_nz)
        out_nz = jax.block_until_ready(
            instance_mlp_forward(teacher_out, student_out, lambda_, packed_nz,
                                 topk_num=topk))
        ref_nz = instance_mlp_reference(teacher_out, student_out, w1, b1, gamma, beta,
                                        w2_nz, b2_nz, topk)
        assert bool(jnp.all(jnp.isfinite(out_nz)))
        assert bool(jnp.allclose(out_nz, ref_nz, atol=1e-3, rtol=1e-3))

    key = jax.random.PRNGKey(0)
    kc1, kc2 = jax.random.split(key)
    run_case(kc1, B=4, C=32, topk=8, inter=16)     # padded lane count < 128
    run_case(kc2, B=4, C=100, topk=10, inter=16)   # non-128-multiple class count (review check)

    print("KERNEL_OK")
</pallas_src>

<mosaic_0001>
module attributes {stable_mosaic.version = 11 : i64} {
  func.func @_instance_mlp_kernel(%arg0: i32, %arg1: memref<4x32xf32, #tpu.memory_space<vmem>>, %arg2: memref<4x32xf32, #tpu.memory_space<vmem>>, %arg3: memref<16x20xf32, #tpu.memory_space<vmem>>, %arg4: memref<1x4xf32, #tpu.memory_space<vmem>>) attributes {dimension_semantics = [#tpu.dimension_semantics<arbitrary>], iteration_bounds = array<i64: 1>, scalar_prefetch = 0 : i64, scratch_operands = 0 : i64, tpu.core_type = #tpu.core_type<tc>, window_params = [{pipeline_mode = #tpu.pipeline_mode<synchronous>, transform_indices = @transform_0, window_bounds = array<i64: 4, 32>}, {pipeline_mode = #tpu.pipeline_mode<synchronous>, transform_indices = @transform_1, window_bounds = array<i64: 4, 32>}, {pipeline_mode = #tpu.pipeline_mode<synchronous>, transform_indices = @transform_2, window_bounds = array<i64: 16, 20>}, {pipeline_mode = #tpu.pipeline_mode<synchronous>, transform_indices = @transform_3, window_bounds = array<i64: 1, 4>}]} {
    %c0 = arith.constant 0 : index
    %c0_0 = arith.constant 0 : index
    %0 = vector.load %arg1[%c0, %c0_0] : memref<4x32xf32, #tpu.memory_space<vmem>>, vector<4x32xf32>
    %c0_1 = arith.constant 0 : index
    %c0_2 = arith.constant 0 : index
    %1 = vector.load %arg2[%c0_1, %c0_2] : memref<4x32xf32, #tpu.memory_space<vmem>>, vector<4x32xf32>
    %cst = arith.constant dense<0xFF800000> : vector<4xf32>
    %2 = vector.multi_reduction <maximumf>, %0, %cst [1] : vector<4x32xf32> to vector<4xf32>
    %3 = vector.shape_cast %2 : vector<4xf32> to vector<4x1xf32>
    %4 = vector.broadcast %3 : vector<4x1xf32> to vector<4x32xf32>
    %5 = arith.subf %0, %4 : vector<4x32xf32>
    %6 = math.exp %5 : vector<4x32xf32>
    %cst_3 = arith.constant dense<0.000000e+00> : vector<4xf32>
    %7 = vector.multi_reduction <add>, %6, %cst_3 [1] : vector<4x32xf32> to vector<4xf32>
    %8 = vector.shape_cast %7 : vector<4xf32> to vector<4x1xf32>
    %9 = tpu.reciprocal %8 {approx = true} : vector<4x1xf32> -> vector<4x1xf32>
    %10 = arith.mulf %8, %9 : vector<4x1xf32>
    %cst_4 = arith.constant 2.000000e+00 : f32
    %11 = vector.broadcast %cst_4 : f32 to vector<4x1xf32>
    %12 = arith.subf %11, %10 : vector<4x1xf32>
    %13 = arith.mulf %9, %12 : vector<4x1xf32>
    %14 = vector.broadcast %13 : vector<4x1xf32> to vector<4x32xf32>
    %15 = arith.mulf %6, %14 : vector<4x32xf32>
    %cst_5 = arith.constant dense<0xFF800000> : vector<4xf32>
    %16 = vector.multi_reduction <maximumf>, %1, %cst_5 [1] : vector<4x32xf32> to vector<4xf32>
    %17 = vector.shape_cast %16 : vector<4xf32> to vector<4x1xf32>
    %18 = vector.broadcast %17 : vector<4x1xf32> to vector<4x32xf32>
    %19 = arith.subf %1, %18 : vector<4x32xf32>
    %20 = math.exp %19 : vector<4x32xf32>
    %cst_6 = arith.constant dense<0.000000e+00> : vector<4xf32>
    %21 = vector.multi_reduction <add>, %20, %cst_6 [1] : vector<4x32xf32> to vector<4xf32>
    %22 = vector.shape_cast %21 : vector<4xf32> to vector<4x1xf32>
    %23 = tpu.reciprocal %22 {approx = true} : vector<4x1xf32> -> vector<4x1xf32>
    %24 = arith.mulf %22, %23 : vector<4x1xf32>
    %cst_7 = arith.constant 2.000000e+00 : f32
    %25 = vector.broadcast %cst_7 : f32 to vector<4x1xf32>
    %26 = arith.subf %25, %24 : vector<4x1xf32>
    %27 = arith.mulf %23, %26 : vector<4x1xf32>
    %28 = vector.broadcast %27 : vector<4x1xf32> to vector<4x32xf32>
    %29 = arith.mulf %20, %28 : vector<4x32xf32>
    %30 = tpu.iota {dimensions = array<i32: 1>} : vector<4x16xi32>
    %cst_8 = arith.constant 0.000000e+00 : f32
    %31 = vector.broadcast %cst_8 : f32 to vector<4x32xf32>
    %32 = arith.cmpf oeq, %5, %31 : vector<4x32xf32>
    %cst_9 = arith.constant 0.000000e+00 : f32
    %33 = vector.broadcast %cst_9 : f32 to vector<4x32xf32>
    %34 = arith.select %32, %29, %33 : vector<4x32xi1>, vector<4x32xf32>
    %cst_10 = arith.constant dense<0.000000e+00> : vector<4xf32>
    %35 = vector.multi_reduction <add>, %34, %cst_10 [1] : vector<4x32xf32> to vector<4xf32>
    %36 = vector.shape_cast %35 : vector<4xf32> to vector<4x1xf32>
    %c0_i32 = arith.constant 0 : i32
    %37 = vector.broadcast %c0_i32 : i32 to vector<4x16xi32>
    %38 = arith.cmpi eq, %30, %37 : vector<4x16xi32>
    %cst_11 = arith.constant 0.000000e+00 : f32
    %39 = vector.shape_cast %13 : vector<4x1xf32> to vector<4x1xf32>
    %40 = vector.broadcast %39 : vector<4x1xf32> to vector<4x16xf32>
    %41 = vector.broadcast %cst_11 : f32 to vector<4x16xf32>
    %42 = arith.select %38, %40, %41 : vector<4x16xi1>, vector<4x16xf32>
    %c8_i32 = arith.constant 8 : i32
    %43 = vector.broadcast %c8_i32 : i32 to vector<4x16xi32>
    %44 = arith.cmpi eq, %30, %43 : vector<4x16xi32>
    %45 = vector.shape_cast %36 : vector<4x1xf32> to vector<4x1xf32>
    %46 = vector.broadcast %45 : vector<4x1xf32> to vector<4x16xf32>
    %47 = arith.select %44, %46, %42 : vector<4x16xi1>, vector<4x16xf32>
    %cst_12 = arith.constant -1.000000e+00 : f32
    %48 = vector.broadcast %cst_12 : f32 to vector<4x32xf32>
    %49 = arith.select %32, %48, %15 : vector<4x32xi1>, vector<4x32xf32>
    %cst_13 = arith.constant dense<0xFF800000> : vector<4xf32>
    %50 = vector.multi_reduction <maximumf>, %49, %cst_13 [1] : vector<4x32xf32> to vector<4xf32>
    %51 = vector.shape_cast %50 : vector<4xf32> to vector<4x1xf32>
    %52 = vector.broadcast %51 : vector<4x1xf32> to vector<4x32xf32>
    %53 = arith.cmpf oeq, %49, %52 : vector<4x32xf32>
    %cst_14 = arith.constant 0.000000e+00 : f32
    %54 = vector.broadcast %cst_14 : f32 to vector<4x32xf32>
    %55 = arith.select %53, %29, %54 : vector<4x32xi1>, vector<4x32xf32>
    %cst_15 = arith.constant dense<0.000000e+00> : vector<4xf32>
    %56 = vector.multi_reduction <add>, %55, %cst_15 [1] : vector<4x32xf32> to vector<4xf32>
    %57 = vector.shape_cast %56 : vector<4xf32> to vector<4x1xf32>
    %c1_i32 = arith.constant 1 : i32
    %58 = vector.broadcast %c1_i32 : i32 to vector<4x16xi32>
    %59 = arith.cmpi eq, %30, %58 : vector<4x16xi32>
    %60 = vector.shape_cast %51 : vector<4x1xf32> to vector<4x1xf32>
    %61 = vector.broadcast %60 : vector<4x1xf32> to vector<4x16xf32>
    %62 = arith.select %59, %61, %47 : vector<4x16xi1>, vector<4x16xf32>
    %c9_i32 = arith.constant 9 : i32
    %63 = vector.broadcast %c9_i32 : i32 to vector<4x16xi32>
    %64 = arith.cmpi eq, %30, %63 : vector<4x16xi32>
    %65 = vector.shape_cast %57 : vector<4x1xf32> to vector<4x1xf32>
    %66 = vector.broadcast %65 : vector<4x1xf32> to vector<4x16xf32>
    %67 = arith.select %64, %66, %62 : vector<4x16xi1>, vector<4x16xf32>
    %cst_16 = arith.constant -1.000000e+00 : f32
    %68 = vector.broadcast %cst_16 : f32 to vector<4x32xf32>
    %69 = arith.select %53, %68, %49 : vector<4x32xi1>, vector<4x32xf32>
    %cst_17 = arith.constant dense<0xFF800000> : vector<4xf32>
    %70 = vector.multi_reduction <maximumf>, %69, %cst_17 [1] : vector<4x32xf32> to vector<4xf32>
    %71 = vector.shape_cast %70 : vector<4xf32> to vector<4x1xf32>
    %72 = vector.broadcast %71 : vector<4x1xf32> to vector<4x32xf32>
    %73 = arith.cmpf oeq, %69, %72 : vector<4x32xf32>
    %cst_18 = arith.constant 0.000000e+00 : f32
    %74 = vector.broadcast %cst_18 : f32 to vector<4x32xf32>
    %75 = arith.select %73, %29, %74 : vector<4x32xi1>, vector<4x32xf32>
    %cst_19 = arith.constant dense<0.000000e+00> : vector<4xf32>
    %76 = vector.multi_reduction <add>, %75, %cst_19 [1] : vector<4x32xf32> to vector<4xf32>
    %77 = vector.shape_cast %76 : vector<4xf32> to vector<4x1xf32>
    %c2_i32 = arith.constant 2 : i32
    %78 = vector.broadcast %c2_i32 : i32 to vector<4x16xi32>
    %79 = arith.cmpi eq, %30, %78 : vector<4x16xi32>
    %80 = vector.shape_cast %71 : vector<4x1xf32> to vector<4x1xf32>
    %81 = vector.broadcast %80 : vector<4x1xf32> to vector<4x16xf32>
    %82 = arith.select %79, %81, %67 : vector<4x16xi1>, vector<4x16xf32>
    %c10_i32 = arith.constant 10 : i32
    %83 = vector.broadcast %c10_i32 : i32 to vector<4x16xi32>
    %84 = arith.cmpi eq, %30, %83 : vector<4x16xi32>
    %85 = vector.shape_cast %77 : vector<4x1xf32> to vector<4x1xf32>
    %86 = vector.broadcast %85 : vector<4x1xf32> to vector<4x16xf32>
    %87 = arith.select %84, %86, %82 : vector<4x16xi1>, vector<4x16xf32>
    %cst_20 = arith.constant -1.000000e+00 : f32
    %88 = vector.broadcast %cst_20 : f32 to vector<4x32xf32>
    %89 = arith.select %73, %88, %69 : vector<4x32xi1>, vector<4x32xf32>
    %cst_21 = arith.constant dense<0xFF800000> : vector<4xf32>
    %90 = vector.multi_reduction <maximumf>, %89, %cst_21 [1] : vector<4x32xf32> to vector<4xf32>
    %91 = vector.shape_cast %90 : vector<4xf32> to vector<4x1xf32>
    %92 = vector.broadcast %91 : vector<4x1xf32> to vector<4x32xf32>
    %93 = arith.cmpf oeq, %89, %92 : vector<4x32xf32>
    %cst_22 = arith.constant 0.000000e+00 : f32
    %94 = vector.broadcast %cst_22 : f32 to vector<4x32xf32>
    %95 = arith.select %93, %29, %94 : vector<4x32xi1>, vector<4x32xf32>
    %cst_23 = arith.constant dense<0.000000e+00> : vector<4xf32>
    %96 = vector.multi_reduction <add>, %95, %cst_23 [1] : vector<4x32xf32> to vector<4xf32>
    %97 = vector.shape_cast %96 : vector<4xf32> to vector<4x1xf32>
    %c3_i32 = arith.constant 3 : i32
    %98 = vector.broadcast %c3_i32 : i32 to vector<4x16xi32>
    %99 = arith.cmpi eq, %30, %98 : vector<4x16xi32>
    %100 = vector.shape_cast %91 : vector<4x1xf32> to vector<4x1xf32>
    %101 = vector.broadcast %100 : vector<4x1xf32> to vector<4x16xf32>
    %102 = arith.select %99, %101, %87 : vector<4x16xi1>, vector<4x16xf32>
    %c11_i32 = arith.constant 11 : i32
    %103 = vector.broadcast %c11_i32 : i32 to vector<4x16xi32>
    %104 = arith.cmpi eq, %30, %103 : vector<4x16xi32>
    %105 = vector.shape_cast %97 : vector<4x1xf32> to vector<4x1xf32>
    %106 = vector.broadcast %105 : vector<4x1xf32> to vector<4x16xf32>
    %107 = arith.select %104, %106, %102 : vector<4x16xi1>, vector<4x16xf32>
    %cst_24 = arith.constant -1.000000e+00 : f32
    %108 = vector.broadcast %cst_24 : f32 to vector<4x32xf32>
    %109 = arith.select %93, %108, %89 : vector<4x32xi1>, vector<4x32xf32>
    %cst_25 = arith.constant dense<0xFF800000> : vector<4xf32>
    %110 = vector.multi_reduction <maximumf>, %109, %cst_25 [1] : vector<4x32xf32> to vector<4xf32>
    %111 = vector.shape_cast %110 : vector<4xf32> to vector<4x1xf32>
    %112 = vector.broadcast %111 : vector<4x1xf32> to vector<4x32xf32>
    %113 = arith.cmpf oeq, %109, %112 : vector<4x32xf32>
    %cst_26 = arith.constant 0.000000e+00 : f32
    %114 = vector.broadcast %cst_26 : f32 to vector<4x32xf32>
    %115 = arith.select %113, %29, %114 : vector<4x32xi1>, vector<4x32xf32>
    %cst_27 = arith.constant dense<0.000000e+00> : vector<4xf32>
    %116 = vector.multi_reduction <add>, %115, %cst_27 [1] : vector<4x32xf32> to vector<4xf32>
    %117 = vector.shape_cast %116 : vector<4xf32> to vector<4x1xf32>
    %c4_i32 = arith.constant 4 : i32
    %118 = vector.broadcast %c4_i32 : i32 to vector<4x16xi32>
    %119 = arith.cmpi eq, %30, %118 : vector<4x16xi32>
    %120 = vector.shape_cast %111 : vector<4x1xf32> to vector<4x1xf32>
    %121 = vector.broadcast %120 : vector<4x1xf32> to vector<4x16xf32>
    %122 = arith.select %119, %121, %107 : vector<4x16xi1>, vector<4x16xf32>
    %c12_i32 = arith.constant 12 : i32
    %123 = vector.broadcast %c12_i32 : i32 to vector<4x16xi32>
    %124 = arith.cmpi eq, %30, %123 : vector<4x16xi32>
    %125 = vector.shape_cast %117 : vector<4x1xf32> to vector<4x1xf32>
    %126 = vector.broadcast %125 : vector<4x1xf32> to vector<4x16xf32>
    %127 = arith.select %124, %126, %122 : vector<4x16xi1>, vector<4x16xf32>
    %cst_28 = arith.constant -1.000000e+00 : f32
    %128 = vector.broadcast %cst_28 : f32 to vector<4x32xf32>
    %129 = arith.select %113, %128, %109 : vector<4x32xi1>, vector<4x32xf32>
    %cst_29 = arith.constant dense<0xFF800000> : vector<4xf32>
    %130 = vector.multi_reduction <maximumf>, %129, %cst_29 [1] : vector<4x32xf32> to vector<4xf32>
    %131 = vector.shape_cast %130 : vector<4xf32> to vector<4x1xf32>
    %132 = vector.broadcast %131 : vector<4x1xf32> to vector<4x32xf32>
    %133 = arith.cmpf oeq, %129, %132 : vector<4x32xf32>
    %cst_30 = arith.constant 0.000000e+00 : f32
    %134 = vector.broadcast %cst_30 : f32 to vector<4x32xf32>
    %135 = arith.select %133, %29, %134 : vector<4x32xi1>, vector<4x32xf32>
    %cst_31 = arith.constant dense<0.000000e+00> : vector<4xf32>
    %136 = vector.multi_reduction <add>, %135, %cst_31 [1] : vector<4x32xf32> to vector<4xf32>
    %137 = vector.shape_cast %136 : vector<4xf32> to vector<4x1xf32>
    %c5_i32 = arith.constant 5 : i32
    %138 = vector.broadcast %c5_i32 : i32 to vector<4x16xi32>
    %139 = arith.cmpi eq, %30, %138 : vector<4x16xi32>
    %140 = vector.shape_cast %131 : vector<4x1xf32> to vector<4x1xf32>
    %141 = vector.broadcast %140 : vector<4x1xf32> to vector<4x16xf32>
    %142 = arith.select %139, %141, %127 : vector<4x16xi1>, vector<4x16xf32>
    %c13_i32 = arith.constant 13 : i32
    %143 = vector.broadcast %c13_i32 : i32 to vector<4x16xi32>
    %144 = arith.cmpi eq, %30, %143 : vector<4x16xi32>
    %145 = vector.shape_cast %137 : vector<4x1xf32> to vector<4x1xf32>
    %146 = vector.broadcast %145 : vector<4x1xf32> to vector<4x16xf32>
    %147 = arith.select %144, %146, %142 : vector<4x16xi1>, vector<4x16xf32>
    %cst_32 = arith.constant -1.000000e+00 : f32
    %148 = vector.broadcast %cst_32 : f32 to vector<4x32xf32>
    %149 = arith.select %133, %148, %129 : vector<4x32xi1>, vector<4x32xf32>
    %cst_33 = arith.constant dense<0xFF800000> : vector<4xf32>
    %150 = vector.multi_reduction <maximumf>, %149, %cst_33 [1] : vector<4x32xf32> to vector<4xf32>
    %151 = vector.shape_cast %150 : vector<4xf32> to vector<4x1xf32>
    %152 = vector.broadcast %151 : vector<4x1xf32> to vector<4x32xf32>
    %153 = arith.cmpf oeq, %149, %152 : vector<4x32xf32>
    %cst_34 = arith.constant 0.000000e+00 : f32
    %154 = vector.broadcast %cst_34 : f32 to vector<4x32xf32>
    %155 = arith.select %153, %29, %154 : vector<4x32xi1>, vector<4x32xf32>
    %cst_35 = arith.constant dense<0.000000e+00> : vector<4xf32>
    %156 = vector.multi_reduction <add>, %155, %cst_35 [1] : vector<4x32xf32> to vector<4xf32>
    %157 = vector.shape_cast %156 : vector<4xf32> to vector<4x1xf32>
    %c6_i32 = arith.constant 6 : i32
    %158 = vector.broadcast %c6_i32 : i32 to vector<4x16xi32>
    %159 = arith.cmpi eq, %30, %158 : vector<4x16xi32>
    %160 = vector.shape_cast %151 : vector<4x1xf32> to vector<4x1xf32>
    %161 = vector.broadcast %160 : vector<4x1xf32> to vector<4x16xf32>
    %162 = arith.select %159, %161, %147 : vector<4x16xi1>, vector<4x16xf32>
    %c14_i32 = arith.constant 14 : i32
    %163 = vector.broadcast %c14_i32 : i32 to vector<4x16xi32>
    %164 = arith.cmpi eq, %30, %163 : vector<4x16xi32>
    %165 = vector.shape_cast %157 : vector<4x1xf32> to vector<4x1xf32>
    %166 = vector.broadcast %165 : vector<4x1xf32> to vector<4x16xf32>
    %167 = arith.select %164, %166, %162 : vector<4x16xi1>, vector<4x16xf32>
    %cst_36 = arith.constant -1.000000e+00 : f32
    %168 = vector.broadcast %cst_36 : f32 to vector<4x32xf32>
    %169 = arith.select %153, %168, %149 : vector<4x32xi1>, vector<4x32xf32>
    %cst_37 = arith.constant dense<0xFF800000> : vector<4xf32>
    %170 = vector.multi_reduction <maximumf>, %169, %cst_37 [1] : vector<4x32xf32> to vector<4xf32>
    %171 = vector.shape_cast %170 : vector<4xf32> to vector<4x1xf32>
    %172 = vector.broadcast %171 : vector<4x1xf32> to vector<4x32xf32>
    %173 = arith.cmpf oeq, %169, %172 : vector<4x32xf32>
    %cst_38 = arith.constant 0.000000e+00 : f32
    %174 = vector.broadcast %cst_38 : f32 to vector<4x32xf32>
    %175 = arith.select %173, %29, %174 : vector<4x32xi1>, vector<4x32xf32>
    %cst_39 = arith.constant dense<0.000000e+00> : vector<4xf32>
    %176 = vector.multi_reduction <add>, %175, %cst_39 [1] : vector<4x32xf32> to vector<4xf32>
    %177 = vector.shape_cast %176 : vector<4xf32> to vector<4x1xf32>
    %c7_i32 = arith.constant 7 : i32
    %178 = vector.broadcast %c7_i32 : i32 to vector<4x16xi32>
    %179 = arith.cmpi eq, %30, %178 : vector<4x16xi32>
    %180 = vector.shape_cast %171 : vector<4x1xf32> to vector<4x1xf32>
    %181 = vector.broadcast %180 : vector<4x1xf32> to vector<4x16xf32>
    %182 = arith.select %179, %181, %167 : vector<4x16xi1>, vector<4x16xf32>
    %c15_i32 = arith.constant 15 : i32
    %183 = vector.broadcast %c15_i32 : i32 to vector<4x16xi32>
    %184 = arith.cmpi eq, %30, %183 : vector<4x16xi32>
    %185 = vector.shape_cast %177 : vector<4x1xf32> to vector<4x1xf32>
    %186 = vector.broadcast %185 : vector<4x1xf32> to vector<4x16xf32>
    %187 = arith.select %184, %186, %182 : vector<4x16xi1>, vector<4x16xf32>
    %c0_40 = arith.constant 0 : index
    %c0_41 = arith.constant 0 : index
    %188 = vector.load %arg3[%c0_40, %c0_41] : memref<16x20xf32, #tpu.memory_space<vmem>>, vector<16x20xf32>
    %189 = vector.extract_strided_slice %188 {offsets = [0, 0], sizes = [16, 16], strides = [1, 1]} : vector<16x20xf32> to vector<16x16xf32>
    %190 = vector.extract_strided_slice %188 {offsets = [0, 16], sizes = [16, 1], strides = [1, 1]} : vector<16x20xf32> to vector<16x1xf32>
    %191 = vector.extract_strided_slice %188 {offsets = [0, 17], sizes = [16, 1], strides = [1, 1]} : vector<16x20xf32> to vector<16x1xf32>
    %192 = vector.extract_strided_slice %188 {offsets = [0, 18], sizes = [16, 1], strides = [1, 1]} : vector<16x20xf32> to vector<16x1xf32>
    %193 = vector.extract_strided_slice %188 {offsets = [0, 19], sizes = [1, 1], strides = [1, 1]} : vector<16x20xf32> to vector<1x1xf32>
    %cst_42 = arith.constant dense<0.000000e+00> : vector<16x4xf32>
    %194 = tpu.matmul %189, %187, %cst_42 {dimension_numbers = #tpu.dot_dimension_numbers<[1], [1], [0], [0], [0, 0, 1, 0], [], []>} : vector<16x16xf32>, vector<4x16xf32>, vector<16x4xf32> -> vector<16x4xf32>
    %cst_43 = arith.constant dense<0.000000e+00> : vector<16xf32>
    %195 = vector.multi_reduction <add>, %194, %cst_43 [1] : vector<16x4xf32> to vector<16xf32>
    %196 = vector.shape_cast %195 : vector<16xf32> to vector<16x1xf32>
    %197 = arith.mulf %194, %194 : vector<16x4xf32>
    %cst_44 = arith.constant dense<0.000000e+00> : vector<16xf32>
    %198 = vector.multi_reduction <add>, %197, %cst_44 [1] : vector<16x4xf32> to vector<16xf32>
    %199 = vector.shape_cast %198 : vector<16xf32> to vector<16x1xf32>
    %cst_45 = arith.constant 2.500000e-01 : f32
    %200 = vector.broadcast %cst_45 : f32 to vector<16x1xf32>
    %201 = arith.mulf %196, %200 : vector<16x1xf32>
    %cst_46 = arith.constant 2.500000e-01 : f32
    %202 = vector.broadcast %cst_46 : f32 to vector<16x1xf32>
    %203 = arith.mulf %199, %202 : vector<16x1xf32>
    %204 = arith.mulf %201, %201 : vector<16x1xf32>
    %205 = arith.subf %203, %204 : vector<16x1xf32>
    %cst_47 = arith.constant 0.000000e+00 : f32
    %206 = vector.broadcast %cst_47 : f32 to vector<16x1xf32>
    %207 = arith.maximumf %205, %206 : vector<16x1xf32>
    %208 = vector.broadcast %201 : vector<16x1xf32> to vector<16x4xf32>
    %209 = arith.subf %194, %208 : vector<16x4xf32>
    %210 = vector.broadcast %190 : vector<16x1xf32> to vector<16x4xf32>
    %211 = arith.mulf %210, %209 : vector<16x4xf32>
    %cst_48 = arith.constant 9.99999974E-6 : f32
    %212 = vector.broadcast %cst_48 : f32 to vector<16x1xf32>
    %213 = arith.addf %207, %212 : vector<16x1xf32>
    %214 = math.rsqrt %213 : vector<16x1xf32>
    %215 = vector.broadcast %214 : vector<16x1xf32> to vector<16x4xf32>
    %216 = arith.mulf %211, %215 : vector<16x4xf32>
    %217 = vector.broadcast %191 : vector<16x1xf32> to vector<16x4xf32>
    %218 = arith.addf %216, %217 : vector<16x4xf32>
    %cst_49 = arith.constant 0.000000e+00 : f32
    %219 = vector.broadcast %cst_49 : f32 to vector<16x4xf32>
    %220 = arith.maximumf %218, %219 : vector<16x4xf32>
    %221 = vector.broadcast %192 : vector<16x1xf32> to vector<16x4xf32>
    %222 = arith.mulf %220, %221 : vector<16x4xf32>
    %cst_50 = arith.constant dense<0.000000e+00> : vector<4xf32>
    %223 = vector.multi_reduction <add>, %222, %cst_50 [0] : vector<16x4xf32> to vector<4xf32>
    %224 = vector.shape_cast %223 : vector<4xf32> to vector<1x4xf32>
    %225 = vector.broadcast %193 : vector<1x1xf32> to vector<1x4xf32>
    %226 = arith.addf %224, %225 : vector<1x4xf32>
    %c0_51 = arith.constant 0 : index
    %c0_52 = arith.constant 0 : index
    %227 = vector.load %arg4[%c0_51, %c0_52] : memref<1x4xf32, #tpu.memory_space<vmem>>, vector<1x4xf32>
    tpu.vector_store %arg4[%c0_51, %c0_52], %226 {strides = array<i32>} : memref<1x4xf32, #tpu.memory_space<vmem>>, vector<1x4xf32>,
    return
  }
  func.func @transform_0(%arg0: i32) -> (i32, i32) {
    %c0_i32 = arith.constant 0 : i32
    %c0_i32_0 = arith.constant 0 : i32
    %c0_i32_1 = arith.constant 0 : i32
    return %c0_i32, %c0_i32_0 : i32, i32
  }
  func.func @transform_1(%arg0: i32) -> (i32, i32) {
    %c0_i32 = arith.constant 0 : i32
    %c0_i32_0 = arith.constant 0 : i32
    %c0_i32_1 = arith.constant 0 : i32
    return %c0_i32, %c0_i32_0 : i32, i32
  }
  func.func @transform_2(%arg0: i32) -> (i32, i32) {
    %c0_i32 = arith.constant 0 : i32
    %c0_i32_0 = arith.constant 0 : i32
    %c0_i32_1 = arith.constant 0 : i32
    return %c0_i32, %c0_i32_0 : i32, i32
  }
  func.func @transform_3(%arg0: i32) -> (i32, i32) {
    %c0_i32 = arith.constant 0 : i32
    %c0_i32_0 = arith.constant 0 : i32
    %c0_i32_1 = arith.constant 0 : i32
    return %c0_i32, %c0_i32_0 : i32, i32
  }
}

</mosaic_0001>

<bundles_post_ra>
// kernel: tpu_custom_call.1
= control target key start
LH: loop header
LB: loop body
LE: loop exit
PB: predicated region body
PF: predicated region fallthrough
CT: control target
= control target key end

     0   :  { %8 = vsyncpa [#allocation3], 0  ;;  %s614_s0 = inlined_call_operand.hbm [shape: f32[4,32], index: 0, kind: input, shape index: {}]   ;;  %s615_s1 = inlined_call_operand.hbm [shape: f32[4,32], index: 1, kind: input, shape index: {}]   ;;  %s616_s2 = inlined_call_operand.hbm [shape: f32[16,20], index: 2, kind: input, shape index: {}]   ;;  %s617_s3 = inlined_call_operand.hbm [shape: f32[1,4], index: 3, kind: output, shape index: {}]  }
   0x1   :  { %9 = vsyncpa [#allocation6], 0 }
   0x2   :  { %10 = vsyncpa [#allocation4], 0  ;;  %s494_s12 = smov [#allocation5]   ;;  %s495_s14 = smov [#allocation2]  }
   0x3   :  { %s27_s13 = sshll.u32 %s494_s12, 4  ;;  %s17_s15 = sshll.u32 %s495_s14, 4  ;;  %s28_s13 = int_to_ptr.vmem [resolvable:$true] %s27_s13  ;;  %s18_s15 = int_to_ptr.vmem [resolvable:$true] %s17_s15 }
   0x4   :  { %s416_s16 = scalar_lea.vmem %s28_s13, 64  ;;  %p421_p1 = scmp.lt.s32.totalorder %s28_s13, %s28_s13 }
   0x5   :  { %p417_p0 = scmp.ne.s32.totalorder %s28_s13, %s416_s16  ;;  %p422_p2 = scmp.lt.s32.totalorder %s416_s16, %s416_s16 }
   0x7   :  { %p423_p3 = por %p422_p2, %p421_p1 }
   0x9   :  { %p424_p4 = pnand %p423_p3, %p417_p0 }
   0xb   :  { %427 = shalt.err (!%p424_p4)
}
   0xc   :  { %30 = dma.hbm_to_vmem [thread:$0]  %s615_s1, 64, %s28_s13, [#allocation6]  }
   0xd   :  { %s436_s19 = scalar_lea.vmem %s18_s15, 64  ;;  %p441_p6 = scmp.lt.s32.totalorder %s18_s15, %s18_s15 }
   0xe   :  { %p437_p5 = scmp.ne.s32.totalorder %s18_s15, %s436_s19  ;;  %p442_p7 = scmp.lt.s32.totalorder %s436_s19, %s436_s19 }
  0x10   :  { %p443_p8 = por %p442_p7, %p441_p6 }
  0x12   :  { %p444_p9 = pnand %p443_p8, %p437_p5 }
  0x14   :  { %447 = shalt.err (!%p444_p9)
}
  0x15   :  { %20 = dma.hbm_to_vmem [thread:$0]  %s614_s0, 64, %s18_s15, [#allocation3]  }
  0x16   :  { %s496_s22 = smov [#allocation7]  }
  0x17   :  { %s36_s23 = sshll.u32 %s496_s22, 4  ;;  %s37_s23 = int_to_ptr.vmem [resolvable:$true] %s36_s23 }
  0x18   :  { %s456_s24 = scalar_lea.vmem %s37_s23, 256  ;;  %p461_p11 = scmp.lt.s32.totalorder %s37_s23, %s37_s23 }
  0x19   :  { %p457_p10 = scmp.ne.s32.totalorder %s37_s23, %s456_s24  ;;  %p462_p12 = scmp.lt.s32.totalorder %s456_s24, %s456_s24 }
  0x1b   :  { %p463_p13 = por %p462_p12, %p461_p11 }
  0x1d   :  { %p464_p0 = pnand %p463_p13, %p457_p10 }
  0x1f   :  { %467 = shalt.err (!%p464_p0)
}
  0x20   :  { %s497_s1 = smov 128   ;;  %s498_s25 = smov 8  }
  0x21   :  { %42 = dma.hbm_to_vmem [thread:$0]  %s616_s2, 256, %s37_s23, [#allocation6], %s497_s1, %s497_s1, %s498_s25  }
  0x22   :  { %488 = dma.done.wait [#allocation3], 64  }
  0x23   :  { %489 = vsyncadd [#allocation3], 4294967232 }
  0x24   :  { %490 = dma.done.wait [#allocation6], 320  }
  0x25   :  { %491 = vsyncadd [#allocation6], 4294966976  ;;  %vm54_vm0 = vcmask 257024   ;;  %v52_v0 = vld [vmem:[#allocation2] sm:$0xf]  ;;  %v83_v60 = vlaneseq  ;;  %s503_s0 = smov [#allocation8]  }
  0x26   :  { %v55_v1 = vsel %vm54_vm0, %v52_v0, -inf  ;;  %v53_v23 = vld [vmem:[#allocation5] sm:$0xf]  ;;  %s359_s2 = sshll.u32 %s503_s0, 4  ;;  %s360_s2 = int_to_ptr.vmem [resolvable:$true] %s359_s2 }
  0x27   :  { %56 = vmax.xlane.f32.xlu0 %v55_v1  ;;  %v69_v25 = vsel %vm54_vm0, %v53_v23, -inf  ;;  %v84_v61 = vand.u32 127, %v83_v60  ;;  %s468_s28 = scalar_lea.vmem %s360_s2, 16  ;;  %s472_s29 = scalar_lea.vmem %s360_s2, 32 }
  0x28   :  { %p469_p1 = scmp.ne.s32.totalorder %s360_s2, %s468_s28  ;;  %p473_p2 = scmp.lt.s32.totalorder %s360_s2, %s360_s2 }
  0x29   :  { %vm90_vm8 = vcmp.eq.s32.totalorder %v84_v61, 0  ;;  %vm92_vm9 = vcmp.eq.s32.totalorder %v84_v61, 8  ;;  %vm103_vm11 = vcmp.eq.s32.totalorder %v84_v61, 1  ;;  %vm105_vm12 = vcmp.eq.s32.totalorder %v84_v61, 9  ;;  %p474_p3 = scmp.lt.s32.totalorder %s472_s29, %s468_s28 }
  0x2a   :  { %vm116_vm13 = vcmp.eq.s32.totalorder %v84_v61, 2  ;;  %vm118_vm14 = vcmp.eq.s32.totalorder %v84_v61, 10  ;;  %vm129_vm15 = vcmp.eq.s32.totalorder %v84_v61, 3 }
  0x2b   :  { %p475_p4 = por %p474_p3, %p473_p2 }
  0x2d   :  { %p476_p5 = pnand %p475_p4, %p469_p1 }
  0xb0   :  { %v57_v2 = vpop.xlane.xlu0 %56 }
  0xb1   :  { %v58_v3 = vsub.f32 %v52_v0, %v57_v2 }
  0xb3   :  { %v59_v4 = vmul.f32 1.442695, %v58_v3  ;;  %vm85_vm1 = vcmp.eq.f32.partialorder %v58_v3, 0.0 }
  0xb5   :  { %396 = vpow2.f32 %v59_v4 }
  0xc2   :  { %v397_v5 = vpop.eup %396 }
  0xc3   :  { %v61_v6 = vsel %vm54_vm0, %v397_v5, 0.0 }
  0xc4   :  { %62 = vadd.xlane.f32.xlu0 %v61_v6 }
 0x14d   :  { %v63_v7 = vpop.xlane.xlu0 %62 }
 0x14e   :  { %398 = vrcp.f32 %v63_v7 }
 0x15b   :  { %v399_v8 = vpop.eup %398 }
 0x15c   :  { %v65_v9 = vmul.f32 %v399_v8, %v63_v7 }
 0x15e   :  { %v66_v10 = vsub.f32 2.0, %v65_v9 }
 0x160   :  { %v535_v11 = vmul.f32 %v399_v8, %v66_v10 }
 0x162   :  { %v68_v12 = vmul.f32 %v397_v5, %v535_v11  ;;  %v91_v63 = vsel %vm90_vm8, %v535_v11, 0.0  ;;  %vm187_vm8 = vcmask 130048  }
 0x164   :  { %v539_v13 = vsel %vm85_vm1, -1.0, %v68_v12 }
 0x165   :  { %v95_v14 = vsel %vm54_vm0, %v539_v13, -inf }
 0x166   :  { %96 = vmax.xlane.f32.xlu1 %v95_v14 }
 0x1ef   :  { %v543_v15 = vpop.xlane.xlu1 %96 }
 0x1f0   :  { %vm98_vm2 = vcmp.eq.f32.partialorder %v539_v13, %v543_v15 }
 0x1f1   :  { %v107_v16 = vsel %vm98_vm2, -1.0, %v539_v13 }
 0x1f2   :  { %v108_v17 = vsel %vm54_vm0, %v107_v16, -inf }
 0x1f3   :  { %109 = vmax.xlane.f32.xlu1 %v108_v17 }
 0x27c   :  { %v552_v18 = vpop.xlane.xlu1 %109 }
 0x27d   :  { %vm111_vm3 = vcmp.eq.f32.partialorder %v107_v16, %v552_v18 }
 0x27e   :  { %v120_v19 = vsel %vm111_vm3, -1.0, %v107_v16 }
 0x27f   :  { %v121_v20 = vsel %vm54_vm0, %v120_v19, -inf }
 0x280   :  { %122 = vmax.xlane.f32.xlu0 %v121_v20 }
 0x309   :  { %v558_v21 = vpop.xlane.xlu0 %122 }
 0x30a   :  { %vm124_vm4 = vcmp.eq.f32.partialorder %v120_v19, %v558_v21 }
 0x30b   :  { %v133_v22 = vsel %vm124_vm4, -1.0, %v120_v19 }
 0x30c   :  { %v134_v24 = vsel %vm54_vm0, %v133_v22, -inf }
 0x30d   :  { %135 = vmax.xlane.f32.xlu1 %v134_v24  ;;  %v499_v24 = vmov 16  }
 0x30e   :  { %390 = vset.pattern.permute.xlu1 %v499_v24  ;;  %391 = vset.pattern.permute.xlu0 %v499_v24 }
 0x311   :  { %70 = vmax.xlane.f32.xlu1 %v69_v25 }
 0x396   :  { %v565_v26 = vpop.xlane.xlu1 %135 }
 0x397   :  { %vm137_vm5 = vcmp.eq.f32.partialorder %v133_v22, %v565_v26 }
 0x398   :  { %v146_v27 = vsel %vm137_vm5, -1.0, %v133_v22 }
 0x399   :  { %v147_v28 = vsel %vm54_vm0, %v146_v27, -inf }
 0x39a   :  { %148 = vmax.xlane.f32.xlu0 %v147_v28  ;;  %v71_v29 = vpop.xlane.xlu1 %70  ;;  %v500_v28 = vmov 17  }
 0x39b   :  { %v72_v30 = vsub.f32 %v53_v23, %v71_v29 }
 0x39d   :  { %v73_v31 = vmul.f32 1.442695, %v72_v30 }
 0x39f   :  { %400 = vpow2.f32 %v73_v31 }
 0x3ac   :  { %v401_v32 = vpop.eup %400 }
 0x3ad   :  { %v75_v33 = vsel %vm54_vm0, %v401_v32, 0.0 }
 0x3ae   :  { %76 = vadd.xlane.f32.xlu1 %v75_v33 }
 0x423   :  { %v572_v34 = vpop.xlane.xlu0 %148 }
 0x424   :  { %vm150_vm6 = vcmp.eq.f32.partialorder %v146_v27, %v572_v34 }
 0x425   :  { %v159_v35 = vsel %vm150_vm6, -1.0, %v146_v27  ;;  %v186_v27 = vld [vmem:[#allocation7 + $0x8] sm:$0xff] }
 0x426   :  { %v160_v36 = vsel %vm54_vm0, %v159_v35, -inf }
 0x427   :  { %161 = vmax.xlane.f32.xlu0 %v160_v36  ;;  %v502_v36 = vmov 19  }
 0x437   :  { %v77_v37 = vpop.xlane.xlu1 %76 }
 0x438   :  { %402 = vrcp.f32 %v77_v37 }
 0x445   :  { %v403_v38 = vpop.eup %402 }
 0x446   :  { %v79_v39 = vmul.f32 %v403_v38, %v77_v37 }
 0x448   :  { %v80_v40 = vsub.f32 2.0, %v79_v39 }
 0x44a   :  { %v81_v41 = vmul.f32 %v403_v38, %v80_v40 }
 0x44c   :  { %v82_v42 = vmul.f32 %v401_v32, %v81_v41 }
 0x44e   :  { %v86_v43 = vsel %vm85_vm1, %v82_v42, 0.0  ;;  %v112_v45 = vsel %vm111_vm3, %v82_v42, 0.0  ;;  %v138_v47 = vsel %vm137_vm5, %v82_v42, 0.0  ;;  %v99_v54 = vsel %vm98_vm2, %v82_v42, 0.0 }
 0x44f   :  { %v87_v44 = vsel %vm54_vm0, %v86_v43, 0.0  ;;  %v113_v46 = vsel %vm54_vm0, %v112_v45, 0.0  ;;  %v139_v48 = vsel %vm54_vm0, %v138_v47, 0.0  ;;  %v100_v55 = vsel %vm54_vm0, %v99_v54, 0.0 }
 0x450   :  { %88 = vadd.xlane.f32.xlu1 %v87_v44  ;;  %v125_v56 = vsel %vm124_vm4, %v82_v42, 0.0  ;;  %v151_v58 = vsel %vm150_vm6, %v82_v42, 0.0  ;;  %vm131_vm1 = vcmp.eq.s32.totalorder %v84_v61, 11  ;;  %vm142_vm2 = vcmp.eq.s32.totalorder %v84_v61, 4 }
 0x451   :  { %v126_v57 = vsel %vm54_vm0, %v125_v56, 0.0  ;;  %v152_v59 = vsel %vm54_vm0, %v151_v58, 0.0  ;;  %vm144_vm3 = vcmp.eq.s32.totalorder %v84_v61, 12  ;;  %vm157_vm4 = vcmp.eq.s32.totalorder %v84_v61, 13 }
 0x452   :  { %vm168_vm5 = vcmp.eq.s32.totalorder %v84_v61, 6  ;;  %vm170_vm6 = vcmp.eq.s32.totalorder %v84_v61, 14 }
 0x454   :  { %114 = vadd.xlane.f32.xlu1 %v113_v46 }
 0x458   :  { %140 = vadd.xlane.f32.xlu1 %v139_v48 }
 0x4b0   :  { %v162_v49 = vpop.xlane.xlu0 %161 }
 0x4b1   :  { %vm163_vm7 = vcmp.eq.f32.partialorder %v159_v35, %v162_v49 }
 0x4b2   :  { %v172_v50 = vsel %vm163_vm7, -1.0, %v159_v35  ;;  %v164_v51 = vsel %vm163_vm7, %v82_v42, 0.0  ;;  %vm181_vm7 = vcmp.eq.s32.totalorder %v84_v61, 7  ;;  %v501_v35 = vmov 18  }
 0x4b3   :  { %v173_v52 = vsel %vm54_vm0, %v172_v50, -inf  ;;  %v165_v53 = vsel %vm54_vm0, %v164_v51, 0.0 }
 0x4b4   :  { %174 = vmax.xlane.f32.xlu0 %v173_v52  ;;  %166 = vadd.xlane.f32.xlu1 %v165_v53 }
 0x4b8   :  { %101 = vadd.xlane.f32.xlu0 %v100_v55 }
 0x4bc   :  { %127 = vadd.xlane.f32.xlu0 %v126_v57 }
 0x4c0   :  { %153 = vadd.xlane.f32.xlu0 %v152_v59 }
 0x4d9   :  { %v89_v62 = vpop.xlane.xlu1 %88 }
 0x4da   :  { %v93_v1 = vsel %vm92_vm9, %v89_v62, %v91_v63  ;;  %vm183_vm9 = vcmp.eq.s32.totalorder %v84_v61, 15 }
 0x4db   :  { %v104_v6 = vsel %vm103_vm11, %v543_v15, %v93_v1  ;;  %vm351_vm11 = vcmask 24576  }
 0x4dd   :  { %v115_v4 = vpop.xlane.xlu1 %114 }
 0x4e1   :  { %v141_v13 = vpop.xlane.xlu1 %140 }
 0x53d   :  { %v175_v0 = vpop.xlane.xlu0 %174  ;;  %v167_v19 = vpop.xlane.xlu1 %166 }
 0x53e   :  { %vm176_vm10 = vcmp.eq.f32.partialorder %v172_v50, %v175_v0 }
 0x53f   :  { %v177_v2 = vsel %vm176_vm10, %v82_v42, 0.0  ;;  %vm272_vm10 = vcmask 31744  }
 0x540   :  { %v178_v3 = vsel %vm54_vm0, %v177_v2, 0.0  ;;  %vm155_vm0 = vcmp.eq.s32.totalorder %v84_v61, 5 }
 0x541   :  { %179 = vadd.xlane.f32.xlu0 %v178_v3  ;;  %v102_v5 = vpop.xlane.xlu0 %101 }
 0x542   :  { %v106_v7 = vsel %vm105_vm12, %v102_v5, %v104_v6 }
 0x543   :  { %v117_v8 = vsel %vm116_vm13, %v552_v18, %v106_v7 }
 0x544   :  { %v119_v9 = vsel %vm118_vm14, %v115_v4, %v117_v8 }
 0x545   :  { %v128_v10 = vpop.xlane.xlu0 %127  ;;  %v130_v11 = vsel %vm129_vm15, %v558_v21, %v119_v9  ;;  %v185_v21 = vld [vmem:[#allocation7] sm:$0xff] }
 0x546   :  { %v132_v12 = vsel %vm131_vm1, %v128_v10, %v130_v11  ;;  %377 = vmatprep.mubr.msk.f32.mxu0 %vm187_vm8, %v185_v21  ;;  %300 = vperm.xlu1 %390, %v185_v21  }
 0x547   :  { %v143_v14 = vsel %vm142_vm2, %v565_v26, %v132_v12 }
 0x548   :  { %v145_v15 = vsel %vm144_vm3, %v141_v13, %v143_v14 }
 0x549   :  { %v154_v16 = vpop.xlane.xlu0 %153  ;;  %v156_v17 = vsel %vm155_vm0, %v572_v34, %v145_v15 }
 0x54a   :  { %v158_v18 = vsel %vm157_vm4, %v154_v16, %v156_v17  ;;  %392 = vset.pattern.permute.xlu1 %v500_v28 }
 0x54b   :  { %v169_v20 = vsel %vm168_vm5, %v162_v49, %v158_v18 }
 0x54c   :  { %v171_v22 = vsel %vm170_vm6, %v167_v19, %v169_v20 }
 0x54d   :  { %v182_v23 = vsel %vm181_vm7, %v175_v0, %v171_v22 }
 0x5c1   :  { %v301_v39 = vpop.permute.xlu1 %300 }
 0x5ca   :  { %v180_v25 = vpop.xlane.xlu0 %179 }
 0x5cb   :  { %v184_v26 = vsel %vm183_vm9, %v180_v25, %v182_v23 }
 0x5cc   :  { %375 = vmatprep.subr.msk.mxu0 %vm187_vm8, %v184_v26 }
 0x5cd   :  { %376 = vmatpush3.xpose.msk.msra.mxu0 %vm187_vm8, %v184_v26 }
 0x5d0   :  { %378 = vmatmul.mubr.msk.f32.vlgmr.msra.gmra.mxu0 %vm187_vm8, %v186_v27 }
 0x690   :  { %v379_v29 = vpop.f32.mrf.mxu0 }
 0x691   :  { %v276_v30 = vsel %vm272_vm10, %v379_v29, 0.0  ;;  %v280_v31 = vmul.f32 %v379_v29, %v379_v29 }
 0x692   :  { %277 = vadd.xlane.f32.xlu0 %v276_v30  ;;  %v263_v32 = vpop.f32.mrf.mxu0 }
 0x693   :  { %v273_v33 = vsel %vm272_vm10, %v263_v32, 0.0  ;;  %v284_v34 = vsel %vm272_vm10, %v280_v31, 0.0  ;;  %v279_v37 = vmul.f32 %v263_v32, %v263_v32 }
 0x694   :  { %274 = vadd.xlane.f32.xlu1 %v273_v33 }
 0x695   :  { %v281_v38 = vsel %vm272_vm10, %v279_v37, 0.0 }
 0x696   :  { %285 = vadd.xlane.f32.xlu0 %v284_v34 }
 0x6a5   :  { %316 = vperm.xlu1 %392, %v185_v21  }
 0x6a9   :  { %320 = vperm.xlu1 %392, %v186_v27  }
 0x6ac   :  { %304 = vperm.xlu0 %391, %v186_v27  }
 0x6ad   :  { %393 = vset.pattern.permute.xlu1 %v501_v35 }
 0x6ae   :  { %328 = vperm.xlu1 %393, %v185_v21  }
 0x6b0   :  { %395 = vset.pattern.permute.xlu0 %v502_v36 }
 0x6d2   :  { %282 = vadd.xlane.f32.xlu1 %v281_v38 }
 0x6e3   :  { %332 = vperm.xlu1 %393, %v186_v27  }
 0x6e7   :  { %394 = vset.pattern.permute.xlu1 %v502_v36 }
 0x6e8   :  { %347 = vperm.xlu1 %394, %v185_v21  }
 0x71b   :  { %v278_v40 = vpop.xlane.xlu0 %277 }
 0x71c   :  { %v288_v43 = vmul.f32 0.25, %v278_v40 }
 0x71d   :  { %v275_v41 = vpop.xlane.xlu1 %274 }
 0x71e   :  { %v292_v46 = vmul.f32 %v288_v43, %v288_v43  ;;  %v287_v51 = vmul.f32 0.25, %v275_v41  ;;  %v298_v60 = vsub.f32 %v379_v29, %v288_v43 }
 0x71f   :  { %v286_v42 = vpop.xlane.xlu0 %285 }
 0x720   :  { %v290_v45 = vmul.f32 0.25, %v286_v42  ;;  %v291_v54 = vmul.f32 %v287_v51, %v287_v51  ;;  %v297_v63 = vsub.f32 %v263_v32, %v287_v51 }
 0x721   :  { %v317_v44 = vpop.permute.xlu1 %316 }
 0x722   :  { %v294_v47 = vsub.f32 %v290_v45, %v292_v46  ;;  %v307_v1 = vmul.f32 %v301_v39, %v297_v63 }
 0x724   :  { %v296_v49 = vmax.f32 %v294_v47, 0.0 }
 0x725   :  { %v321_v48 = vpop.permute.xlu1 %320 }
 0x726   :  { %v310_v52 = vadd.f32 1e-05, %v296_v49 }
 0x727   :  { %v305_v59 = vpop.permute.xlu0 %304 }
 0x728   :  { %404 = vrsqrt.f32 %v310_v52  ;;  %v308_v62 = vmul.f32 %v305_v59, %v298_v60 }
 0x729   :  { %v329_v50 = vpop.permute.xlu1 %328 }
 0x735   :  { %v405_v61 = vpop.eup %404 }
 0x736   :  { %v314_v0 = vmul.f32 %v405_v61, %v308_v62 }
 0x738   :  { %v324_v2 = vadd.f32 %v321_v48, %v314_v0 }
 0x73a   :  { %v326_v7 = vmax.f32 %v324_v2, 0.0 }
 0x75b   :  { %v283_v53 = vpop.xlane.xlu1 %282 }
 0x75c   :  { %v289_v55 = vmul.f32 0.25, %v283_v53 }
 0x75e   :  { %v293_v56 = vsub.f32 %v289_v55, %v291_v54 }
 0x75f   :  { %v333_v5 = vpop.permute.xlu1 %332 }
 0x760   :  { %v295_v57 = vmax.f32 %v293_v56, 0.0  ;;  %v336_v9 = vmul.f32 %v333_v5, %v326_v7 }
 0x762   :  { %v309_v58 = vadd.f32 1e-05, %v295_v57  ;;  %v338_v12 = vsel %vm272_vm10, %v336_v9, 0.0 }
 0x763   :  { %v348_v19 = vpop.permute.xlu1 %347 }
 0x764   :  { %406 = vrsqrt.f32 %v309_v58 }
 0x771   :  { %v407_v3 = vpop.eup %406 }
 0x772   :  { %v313_v4 = vmul.f32 %v407_v3, %v307_v1 }
 0x774   :  { %v323_v6 = vadd.f32 %v317_v44, %v313_v4 }
 0x776   :  { %v325_v8 = vmax.f32 %v323_v6, 0.0 }
 0x778   :  { %v335_v10 = vmul.f32 %v329_v50, %v325_v8 }
 0x77a   :  { %v337_v11 = vsel %vm272_vm10, %v335_v10, 0.0 }
 0x77b   :  { %v339_v13 = vadd.f32 %v338_v12, %v337_v11 }
 0x77d   :  { %v340_v14 = vrot.slane %v339_v13, 4 }
 0x77f   :  { %v341_v15 = vadd.f32 %v340_v14, %v339_v13 }
 0x781   :  { %v342_v16 = vrot.slane %v341_v15, 2 }
 0x783   :  { %v343_v17 = vadd.f32 %v342_v16, %v341_v15 }
 0x785   :  { %v344_v18 = vrot.slane %v343_v17, 1 }
 0x787   :  { %v345_v20 = vadd.f32 %v344_v18, %v343_v17 }
 0x789   :  { %v350_v22 = vadd.f32 %v348_v19, %v345_v20 }
 0x78b   :  { %352 = vst.msk [vmem:[#allocation8] sm:$0x1] %vm351_vm11, %v350_v22 }
 0x78c   :  { %479 = shalt.err (!%p476_p5)
}
 0x78d   :  { %362 = dma.vmem_to_hbm [thread:$0]  %s360_s2, 16, %s617_s3, [#allocation4]  }
 0x78e   :  { %492 = dma.done.wait [#allocation4], 16  }
 0x78f   :  { %493 = vsyncadd [#allocation4], 4294967280 }
 0x790   :  { %366 = vsyncpa [#allocation3], 1 }
 0x791   :  { %367 = vsyncpa [#allocation6], 1 }
 0x792   :  { %368 = vsyncpa [#allocation4], 1 }

</bundles_post_ra>
